<compile_context>
chip_gen: v7x
topology: tpu7x:2x2x1
jax: 0.10.0
libtpu: 0.0.40
codegen_flags: <defaults>
</compile_context>

<pallas_src>
import functools

import jax
import jax.numpy as jnp
from jax.experimental import pallas as pl
from jax.experimental.pallas import tpu as pltpu


def _film_kernel(Cp, x_ref, c_ref, w_ref, b_ref, o_ref):
    # x_ref: (C, TILE_T), c_ref: (Cc, TILE_T), w_ref: (2*Cp, Cc), b_ref: (2*Cp, 1)
    proj = jnp.dot(
        w_ref[...], c_ref[...],
        preferred_element_type=jnp.float32,
        precision=jax.lax.Precision.HIGHEST,
    )
    proj = proj + b_ref[...]                 # bias added once per tile
    C = o_ref.shape[0]
    mu = proj[:C, :]                         # rows [0, C)      (aligned at 0)
    sigma = proj[Cp:Cp + C, :]               # rows [Cp, Cp+C)  (Cp % 8 == 0)
    o_ref[...] = (x_ref[...] * mu + sigma).astype(o_ref.dtype)


def _tpu_vmem_capacity():
    try:
        return int(pltpu.get_tpu_info().vmem_capacity_bytes)
    except Exception:
        return 64 << 20        # conservative (v7x per-TC physical VMEM)


def _pick_tile_t(T, C, Cp, Cc, budget_bytes, w_buffers):
    """Largest multiple of 128 (<= T) whose working set fits budget_bytes.

    Accounts for:
      * streamed x (C,t) + c (Cc,t) + out (C,t), f32, double-buffered,
      * the (2*Cp, t) f32 projection temporary,
      * the RESIDENT stacked weight (2*Cp, Cc) (w_buffers copies) + bias.
    """
    if T < 128:
        return T                               # full-dim block is always legal
    resident = 4 * (2 * Cp) * (Cc * w_buffers + 1)
    per_col = 4 * (2 * (2 * C + Cc) + 2 * Cp)
    avail = max(budget_bytes - resident, per_col * 128)
    tile = max(128, (avail // per_col) // 128 * 128)
    tile = min(tile, (T // 128) * 128)         # never exceed the array extent
    return tile


def _build_call(B, C, Cp, Cc, T, tile_t, out_dtype, vmem_limit, single_buffer_w):
    w_kwargs = {"pipeline_mode": pl.Buffered(1)} if single_buffer_w else {}
    grid = (B, pl.cdiv(T, tile_t))

    grid_spec = pltpu.PrefetchScalarGridSpec(
        num_scalar_prefetch=0,
        grid=grid,
        in_specs=[
            # Batch dim squeezed out of the kernel view (size-1 block dim).
            pl.BlockSpec((None, C, tile_t), lambda bi, ti: (bi, 0, ti)),    # x
            pl.BlockSpec((None, Cc, tile_t), lambda bi, ti: (bi, 0, ti)),   # c
            # Grid-invariant stacked weight / bias: fetched once.
            pl.BlockSpec((2 * Cp, Cc), lambda bi, ti: (0, 0), **w_kwargs),  # W
            pl.BlockSpec((2 * Cp, 1), lambda bi, ti: (0, 0), **w_kwargs),   # b
        ],
        out_specs=pl.BlockSpec((None, C, tile_t), lambda bi, ti: (bi, 0, ti)),
    )

    flops = 2 * B * (2 * Cp) * Cc * T + 3 * B * C * T
    bytes_accessed = 4 * (B * T * (2 * C + Cc) + 2 * Cp * (Cc + 1))

    return pl.pallas_call(
        functools.partial(_film_kernel, Cp),
        out_shape=jax.ShapeDtypeStruct((B, C, T), out_dtype),
        grid_spec=grid_spec,
        compiler_params=pltpu.CompilerParams(
            dimension_semantics=("parallel", "parallel"),
            vmem_limit_bytes=vmem_limit,
        ),
        cost_estimate=pl.CostEstimate(
            flops=flops, transcendentals=0, bytes_accessed=bytes_accessed),
    )


def film(x, c, w_mu, b_mu, w_sigma, b_sigma):
    B, C, T = x.shape
    Bc, Cc, Tc = c.shape
    assert (Bc, Tc) == (B, T)
    assert w_mu.shape == (C, Cc) and w_sigma.shape == (C, Cc)
    assert b_mu.shape == (C,) and b_sigma.shape == (C,)

    # Sublane-align the mu/sigma split for arbitrary C.
    Cp = ((C + 7) // 8) * 8

    w = jnp.zeros((2 * Cp, Cc), jnp.float32)
    w = w.at[:C].set(w_mu.astype(jnp.float32))
    w = w.at[Cp:Cp + C].set(w_sigma.astype(jnp.float32))
    b = jnp.zeros((2 * Cp, 1), jnp.float32)
    b = b.at[:C, 0].set(b_mu.astype(jnp.float32))
    b = b.at[Cp:Cp + C, 0].set(b_sigma.astype(jnp.float32))

    cap = _tpu_vmem_capacity()
    budget = min(max(cap // 3, 8 << 20), 40 << 20)    # streamed + resident budget
    vmem_limit = int(min(cap * 3 // 4, 64 << 20))

    # Preferred path: single-buffered weight (account 1 copy in the budget).
    tile_t = _pick_tile_t(T, C, Cp, Cc, budget, w_buffers=1)
    # Keep >=2 independent grid items so both v7x TensorCores get work.
    if B == 1 and T >= 256:
        tile_t = min(tile_t, max(128, (pl.cdiv(T, 2) // 128) * 128))

    try:
        fn = _build_call(B, C, Cp, Cc, T, tile_t, x.dtype, vmem_limit,
                         single_buffer_w=True)
        return fn(x, c, w, b)
    except Exception:
        # Fallback: default (double-buffered) weight; re-budget the tile.
        tile_t2 = min(tile_t, _pick_tile_t(T, C, Cp, Cc, budget, w_buffers=2))
        fn = _build_call(B, C, Cp, Cc, T, tile_t2, x.dtype, vmem_limit,
                         single_buffer_w=False)
        return fn(x, c, w, b)


if __name__ == "__main__":
    # Small shapes consistent with the module's forward (1x1 Conv1d FiLM).
    B, C, Cc, T = 2, 8, 16, 128

    key = jax.random.PRNGKey(0)
    kx, kc, k1, k2, k3, k4 = jax.random.split(key, 6)

    x = jax.random.normal(kx, (B, C, T), dtype=jnp.float32)
    c = jax.random.normal(kc, (B, Cc, T), dtype=jnp.float32)

    # Deterministic synthetic Conv1d(kernel_size=1) parameters.
    w_mu = jax.random.normal(k1, (C, Cc), dtype=jnp.float32) * 0.1
    b_mu = jax.random.normal(k2, (C,), dtype=jnp.float32) * 0.1
    w_sigma = jax.random.normal(k3, (C, Cc), dtype=jnp.float32) * 0.1
    b_sigma = jax.random.normal(k4, (C,), dtype=jnp.float32) * 0.1

    out = film(x, c, w_mu, b_mu, w_sigma, b_sigma)
    out = jax.block_until_ready(out)

    # Pure-JAX reference (1x1 Conv1d == per-timestep linear), exact f32.
    hi = jax.lax.Precision.HIGHEST
    mu_ref = jnp.einsum("ck,bkt->bct", w_mu, c, precision=hi) + b_mu[None, :, None]
    sg_ref = jnp.einsum("ck,bkt->bct", w_sigma, c, precision=hi) + b_sigma[None, :, None]
    ref = x * mu_ref + sg_ref

    assert out.shape == (B, C, T)
    assert jnp.allclose(out, ref, atol=1e-5, rtol=1e-5), "mismatch vs reference"
    print("KERNEL_OK")
</pallas_src>

<mosaic_0001>
module attributes {stable_mosaic.version = 11 : i64} {
  func.func @_film_kernel(%arg0: i32, %arg1: i32, %arg2: memref<1x8x128xf32, #tpu.memory_space<vmem>>, %arg3: memref<1x16x128xf32, #tpu.memory_space<vmem>>, %arg4: memref<16x16xf32, #tpu.memory_space<vmem>>, %arg5: memref<16x1xf32, #tpu.memory_space<vmem>>, %arg6: memref<1x8x128xf32, #tpu.memory_space<vmem>>) attributes {dimension_semantics = [#tpu.dimension_semantics<parallel>, #tpu.dimension_semantics<parallel>], iteration_bounds = array<i64: 2, 1>, scalar_prefetch = 0 : i64, scratch_operands = 0 : i64, tpu.core_type = #tpu.core_type<tc>, window_params = [{transform_indices = @transform_0, window_bounds = array<i64: 1, 8, 128>}, {transform_indices = @transform_1, window_bounds = array<i64: 1, 16, 128>}, {pipeline_mode = #tpu.pipeline_mode<synchronous>, transform_indices = @transform_2, window_bounds = array<i64: 16, 16>}, {pipeline_mode = #tpu.pipeline_mode<synchronous>, transform_indices = @transform_3, window_bounds = array<i64: 16, 1>}, {transform_indices = @transform_4, window_bounds = array<i64: 1, 8, 128>}]} {
    %c0 = arith.constant 0 : index
    %c0_0 = arith.constant 0 : index
    %0 = vector.load %arg4[%c0, %c0_0] : memref<16x16xf32, #tpu.memory_space<vmem>>, vector<16x16xf32>
    %c0_1 = arith.constant 0 : index
    %c0_2 = arith.constant 0 : index
    %c0_3 = arith.constant 0 : index
    %1 = vector.load %arg3[%c0_1, %c0_2, %c0_3] : memref<1x16x128xf32, #tpu.memory_space<vmem>>, vector<1x16x128xf32>
    %2 = vector.shape_cast %1 : vector<1x16x128xf32> to vector<16x128xf32>
    %cst = arith.constant dense<0.000000e+00> : vector<16x128xf32>
    %3 = tpu.matmul %0, %2, %cst {dimension_numbers = #tpu.dot_dimension_numbers<[1], [0], [0], [1], [0, 0, 1, 1], [], []>, precision = #tpu.contract_precision<fp32>} : vector<16x16xf32>, vector<16x128xf32>, vector<16x128xf32> -> vector<16x128xf32>
    %c0_4 = arith.constant 0 : index
    %c0_5 = arith.constant 0 : index
    %4 = vector.load %arg5[%c0_4, %c0_5] : memref<16x1xf32, #tpu.memory_space<vmem>>, vector<16x1xf32>
    %5 = vector.broadcast %4 : vector<16x1xf32> to vector<16x128xf32>
    %6 = arith.addf %3, %5 : vector<16x128xf32>
    %7 = vector.extract_strided_slice %6 {offsets = [0, 0], sizes = [8, 128], strides = [1, 1]} : vector<16x128xf32> to vector<8x128xf32>
    %8 = vector.extract_strided_slice %6 {offsets = [8, 0], sizes = [8, 128], strides = [1, 1]} : vector<16x128xf32> to vector<8x128xf32>
    %c0_6 = arith.constant 0 : index
    %c0_7 = arith.constant 0 : index
    %c0_8 = arith.constant 0 : index
    %9 = vector.load %arg2[%c0_6, %c0_7, %c0_8] : memref<1x8x128xf32, #tpu.memory_space<vmem>>, vector<1x8x128xf32>
    %10 = vector.shape_cast %9 : vector<1x8x128xf32> to vector<8x128xf32>
    %11 = arith.mulf %10, %7 : vector<8x128xf32>
    %12 = arith.addf %11, %8 : vector<8x128xf32>
    %c0_9 = arith.constant 0 : index
    %c0_10 = arith.constant 0 : index
    %c0_11 = arith.constant 0 : index
    %13 = vector.load %arg6[%c0_9, %c0_10, %c0_11] : memref<1x8x128xf32, #tpu.memory_space<vmem>>, vector<1x8x128xf32>
    %14 = vector.shape_cast %13 : vector<1x8x128xf32> to vector<8x128xf32>
    %15 = vector.shape_cast %12 : vector<8x128xf32> to vector<1x8x128xf32>
    tpu.vector_store %arg6[%c0_9, %c0_10, %c0_11], %15 {strides = array<i32>} : memref<1x8x128xf32, #tpu.memory_space<vmem>>, vector<1x8x128xf32>,
    return
  }
  func.func @transform_0(%arg0: i32, %arg1: i32) -> (i32, i32, i32) {
    %c0_i32 = arith.constant 0 : i32
    %c0_i32_0 = arith.constant 0 : i32
    return %arg0, %c0_i32, %arg1 : i32, i32, i32
  }
  func.func @transform_1(%arg0: i32, %arg1: i32) -> (i32, i32, i32) {
    %c0_i32 = arith.constant 0 : i32
    %c0_i32_0 = arith.constant 0 : i32
    return %arg0, %c0_i32, %arg1 : i32, i32, i32
  }
  func.func @transform_2(%arg0: i32, %arg1: i32) -> (i32, i32) {
    %c0_i32 = arith.constant 0 : i32
    %c0_i32_0 = arith.constant 0 : i32
    %c0_i32_1 = arith.constant 0 : i32
    return %c0_i32, %c0_i32_0 : i32, i32
  }
  func.func @transform_3(%arg0: i32, %arg1: i32) -> (i32, i32) {
    %c0_i32 = arith.constant 0 : i32
    %c0_i32_0 = arith.constant 0 : i32
    %c0_i32_1 = arith.constant 0 : i32
    return %c0_i32, %c0_i32_0 : i32, i32
  }
  func.func @transform_4(%arg0: i32, %arg1: i32) -> (i32, i32, i32) {
    %c0_i32 = arith.constant 0 : i32
    %c0_i32_0 = arith.constant 0 : i32
    return %arg0, %c0_i32, %arg1 : i32, i32, i32
  }
}

module attributes {stable_mosaic.version = 11 : i64} {
  func.func @_film_kernel(%arg0: i32, %arg1: i32, %arg2: memref<1x8x128xf32, #tpu.memory_space<vmem>>, %arg3: memref<1x16x128xf32, #tpu.memory_space<vmem>>, %arg4: memref<16x16xf32, #tpu.memory_space<vmem>>, %arg5: memref<16x1xf32, #tpu.memory_space<vmem>>, %arg6: memref<1x8x128xf32, #tpu.memory_space<vmem>>) attributes {dimension_semantics = [#tpu.dimension_semantics<parallel>, #tpu.dimension_semantics<parallel>], iteration_bounds = array<i64: 2, 1>, scalar_prefetch = 0 : i64, scratch_operands = 0 : i64, tpu.core_type = #tpu.core_type<tc>, window_params = [{transform_indices = @transform_0, window_bounds = array<i64: 1, 8, 128>}, {transform_indices = @transform_1, window_bounds = array<i64: 1, 16, 128>}, {pipeline_mode = #tpu.pipeline_mode<synchronous>, transform_indices = @transform_2, window_bounds = array<i64: 16, 16>}, {pipeline_mode = #tpu.pipeline_mode<synchronous>, transform_indices = @transform_3, window_bounds = array<i64: 16, 1>}, {transform_indices = @transform_4, window_bounds = array<i64: 1, 8, 128>}]} {
    %c0 = arith.constant 0 : index
    %c0_0 = arith.constant 0 : index
    %0 = vector.load %arg4[%c0, %c0_0] : memref<16x16xf32, #tpu.memory_space<vmem>>, vector<16x16xf32>
    %c0_1 = arith.constant 0 : index
    %c0_2 = arith.constant 0 : index
    %c0_3 = arith.constant 0 : index
    %1 = vector.load %arg3[%c0_1, %c0_2, %c0_3] : memref<1x16x128xf32, #tpu.memory_space<vmem>>, vector<1x16x128xf32>
    %2 = vector.shape_cast %1 : vector<1x16x128xf32> to vector<16x128xf32>
    %cst = arith.constant dense<0.000000e+00> : vector<16x128xf32>
    %3 = tpu.matmul %0, %2, %cst {dimension_numbers = #tpu.dot_dimension_numbers<[1], [0], [0], [1], [0, 0, 1, 1], [], []>, precision = #tpu.contract_precision<fp32>} : vector<16x16xf32>, vector<16x128xf32>, vector<16x128xf32> -> vector<16x128xf32>
    %c0_4 = arith.constant 0 : index
    %c0_5 = arith.constant 0 : index
    %4 = vector.load %arg5[%c0_4, %c0_5] : memref<16x1xf32, #tpu.memory_space<vmem>>, vector<16x1xf32>
    %5 = vector.broadcast %4 : vector<16x1xf32> to vector<16x128xf32>
    %6 = arith.addf %3, %5 : vector<16x128xf32>
    %7 = vector.extract_strided_slice %6 {offsets = [0, 0], sizes = [8, 128], strides = [1, 1]} : vector<16x128xf32> to vector<8x128xf32>
    %8 = vector.extract_strided_slice %6 {offsets = [8, 0], sizes = [8, 128], strides = [1, 1]} : vector<16x128xf32> to vector<8x128xf32>
    %c0_6 = arith.constant 0 : index
    %c0_7 = arith.constant 0 : index
    %c0_8 = arith.constant 0 : index
    %9 = vector.load %arg2[%c0_6, %c0_7, %c0_8] : memref<1x8x128xf32, #tpu.memory_space<vmem>>, vector<1x8x128xf32>
    %10 = vector.shape_cast %9 : vector<1x8x128xf32> to vector<8x128xf32>
    %11 = arith.mulf %10, %7 : vector<8x128xf32>
    %12 = arith.addf %11, %8 : vector<8x128xf32>
    %c0_9 = arith.constant 0 : index
    %c0_10 = arith.constant 0 : index
    %c0_11 = arith.constant 0 : index
    %13 = vector.load %arg6[%c0_9, %c0_10, %c0_11] : memref<1x8x128xf32, #tpu.memory_space<vmem>>, vector<1x8x128xf32>
    %14 = vector.shape_cast %13 : vector<1x8x128xf32> to vector<8x128xf32>
    %15 = vector.shape_cast %12 : vector<8x128xf32> to vector<1x8x128xf32>
    tpu.vector_store %arg6[%c0_9, %c0_10, %c0_11], %15 {strides = array<i32>} : memref<1x8x128xf32, #tpu.memory_space<vmem>>, vector<1x8x128xf32>,
    return
  }
  func.func @transform_0(%arg0: i32, %arg1: i32) -> (i32, i32, i32) {
    %c0_i32 = arith.constant 0 : i32
    %c0_i32_0 = arith.constant 0 : i32
    return %arg0, %c0_i32, %arg1 : i32, i32, i32
  }
  func.func @transform_1(%arg0: i32, %arg1: i32) -> (i32, i32, i32) {
    %c0_i32 = arith.constant 0 : i32
    %c0_i32_0 = arith.constant 0 : i32
    return %arg0, %c0_i32, %arg1 : i32, i32, i32
  }
  func.func @transform_2(%arg0: i32, %arg1: i32) -> (i32, i32) {
    %c0_i32 = arith.constant 0 : i32
    %c0_i32_0 = arith.constant 0 : i32
    %c0_i32_1 = arith.constant 0 : i32
    return %c0_i32, %c0_i32_0 : i32, i32
  }
  func.func @transform_3(%arg0: i32, %arg1: i32) -> (i32, i32) {
    %c0_i32 = arith.constant 0 : i32
    %c0_i32_0 = arith.constant 0 : i32
    %c0_i32_1 = arith.constant 0 : i32
    return %c0_i32, %c0_i32_0 : i32, i32
  }
  func.func @transform_4(%arg0: i32, %arg1: i32) -> (i32, i32, i32) {
    %c0_i32 = arith.constant 0 : i32
    %c0_i32_0 = arith.constant 0 : i32
    return %arg0, %c0_i32, %arg1 : i32, i32, i32
  }
}

</mosaic_0001>

<bundles_post_ra>
// kernel: tpu_custom_call.1
= control target key start
LH: loop header
LB: loop body
LE: loop exit
PB: predicated region body
PF: predicated region fallthrough
CT: control target
= control target key end

     0   :  { %9 = vsyncpa [#allocation3], 0  ;;  %s1535_s0 = inlined_call_operand.vmem [shape: f32[2,8,128], index: 0, kind: input, shape index: {}]   ;;  %s1536_s1 = inlined_call_operand.hbm [shape: f32[2,16,128], index: 1, kind: input, shape index: {}]   ;;  %s1537_s2 = inlined_call_operand.hbm [shape: f32[16,16], index: 2, kind: input, shape index: {}]   ;;  %s1538_s3 = inlined_call_operand.vmem [shape: f32[16,1], index: 3, kind: input, shape index: {}]   ;;  %s1539_s4 = inlined_call_operand.hbm [shape: f32[2,8,128], index: 4, kind: output, shape index: {}]  }
   0x1   :  { %11 = vsyncpa [#allocation3 + $0x1], 0 }
   0x2   :  { %12 = vsyncpa [#allocation6], 0 }
   0x3   :  { %13 = vsyncpa [#allocation4], 0 }
   0x4   :  { %15 = vsyncpa [#allocation4 + $0x1], 0  ;;  %s1300_s15 = smov 0   ;;  %s1302_s16 = smov 0  }
   0x5   :  { %s1304_s17 = smov 0   ;;  %s1306_s18 = smov 0  }
   0x6   :  { %s1308_s19 = smov 0   ;;  %s1310_s20 = smov 0  }
   0x7 LB: > { %s926_s21 = sadd.s32 4294967295, %s1267_s20   ;;  %s927_s22 = sadd.s32 4294967294, %s1267_s20   ;;  %s1267_s20 = sphi %s1310_s20, %s21_s20   ;;  %s1263_s19 = sphi %s1308_s19, %s1563_s19   ;;  %s1259_s18 = sphi %s1306_s18, %s1562_s18   ;;  %s1255_s17 = sphi %s1304_s17, %s1561_s17   ;;  %s1251_s16 = sphi %s1302_s16, %s1560_s16   ;;  %s1247_s15 = sphi %s1300_s15, %s1559_s15  }
   0x8   : > { %p83_p0 = scmp.ne.s32.totalorder %s1251_s16, %s1247_s15  ;;  %p1334_p1 = scmp.eq.s32.totalorder %s926_s21, 0 }
   0x9   : > { %p1338_p2 = scmp.eq.s32.totalorder %s926_s21, 1  ;;  %p157_p3 = scmp.eq.s32.totalorder %s927_s22, 1 }
   0xa   : > { %s1544_s23 = scalar_select %p1334_p1, 1, 0 }
   0xb   : > { %s1545_s24 = scalar_select %p1338_p2, 1, 0 }
   0xc   : > { %p1344_p4 = por %p1334_p1, %p83_p0  ;;  %p928_p5 = scmp.ge.s32.totalorder %s1267_s20, 1 }
   0xd   : > { %p1349_p6 = por %p157_p3, %p83_p0  ;;  %p164_p7 = scmp.lt.s32.totalorder %s1267_s20, 3 }
   0xe   : > { %s1546_s25 = scalar_select %p1344_p4, 1, 0 }
   0xf   : > { %s1547_s26 = scalar_select %p1349_p6, 1, 0 }
  0x10   : > { %p1354_p8 = pnand %p928_p5, %p164_p7  ;;  %s1269_s28 = smov [#allocation5]  }
  0x11   : > { %s176_s29 = sshll.u32 %s1269_s28, 4  ;;  %s33_s5 = sadd.s32 1, %s1263_s19  ;;  %s177_s29 = int_to_ptr.vmem [resolvable:$true] %s176_s29 }
  0x12   : > { %s1548_s27 = scalar_select %p1354_p8, 1, 0 }
  0x13   : > { %p1054_p9 = pneg %p1354_p8  ;;  %s1123_s8 = scalar_lea.hbm %s1537_s2, 256 }
  0x14   : > { %p1124_p12 = scmp.ne.s32.totalorder %s1537_s2, %s1123_s8  ;;  %p1130_p5 = scmp.lt.u32.totalorder %s1123_s8, %s1537_s2 }
  0x15   : > { %p1363_p11 = pnand %p1054_p9, %p1334_p1 }
  0x17   : > { %p1125_p13 = pneg %p1363_p11 }
  0x19   : > { %p1126_p0 = pnand %p1125_p13, %p1124_p12 }
  0x1b   : > { %p1127_p3 = pneg %p1126_p0 }
  0x1d   : > { %p1132_p7 = pnand %p1130_p5, %p1127_p3 }
  0x1f   : > { %1135 = shalt.err (!%p1132_p7)
}
  0x20   : > { %s1136_s13 = scalar_lea.vmem %s177_s29, 256  ;;  %p1144_p1 = scmp.lt.s32.totalorder %s177_s29, %s177_s29 }
  0x21   : > { %p1137_p9 = scmp.ne.s32.totalorder %s177_s29, %s1136_s13  ;;  %p1145_p4 = scmp.lt.s32.totalorder %s1136_s13, %s1136_s13 }
  0x23   : > { %p1139_p10 = pnand %p1137_p9, %p1125_p13  ;;  %p1146_p8 = por %p1145_p4, %p1144_p1 }
  0x25   : > { %p1140_p6 = pneg %p1139_p10 }
  0x27   : > { %p1147_p2 = pnand %p1146_p8, %p1140_p6 }
  0x29   : > { %1150 = shalt.err (!%p1147_p2)
}
  0x2a   : > { %s1270_s14 = smov 128   ;;  %s1271_s21 = smov 8  }
  0x2b   : > { %1057 = dma.hbm_to_vmem [thread:$0]  (!%p1363_p11), %s1537_s2, 256, %s177_s29, [#allocation6], %s1270_s14, %s1270_s14, %s1271_s21  }
  0x2c   : > { %p35_p1 = scmp.ge.s32.totalorder %s33_s5, 2  ;;  %s70_s6 = sadd.s32 1, %s1255_s17 }
  0x2d   : > { %p77_p2 = scmp.ne.s32.totalorder %s1255_s17, %s1251_s16  ;;  %p78_p4 = scmp.eq.s32.totalorder %s1267_s20, 0 }
  0x2e   : > { %s1565_s5 = smov (%p35_p1, %s33_s5), 0  ;;  %p1551_p8 = scmp.ne.s32.totalorder %s1545_s24, 0 }
  0x2f   : > { %p1393_p6 = por %p78_p4, %p77_p2  ;;  %s65_s8 = ssub.s32 %s1263_s19, %s1565_s5 }
  0x30   : > { %p1399_p10 = por %p1551_p8, %p77_p2  ;;  %p1067_p12 = scmp.lt.s32.totalorder %s1267_s20, 2 }
  0x31   : > { %p68_p11 = scmp.eq.s32.totalorder %s65_s8, 0  ;;  %s203_s29 = sand.u32 1, %s1255_s17  }
  0x32   : > { %s931_s9 = sshll.u32 %s203_s29, 4  ;;  %s943_s11 = sshll.u32 %s1263_s19, 8 }
  0x33   : > { %s1408_s10 = scalar_select %p68_p11, %s1255_s17, %s70_s6  }
  0x34   : > { %s1414_s22 = scalar_lea.hbm %s1536_s1, %s943_s11  ;;  %s207_s24 = scalar_lea.vmem [#allocation2], %s931_s9 }
  0x35   : > { %s215_s28 = sshll.u32 %s207_s24, 4  ;;  %p1420_p13 = pnand %p1067_p12, %p1393_p6  ;;  %s1416_s28 = int_to_ptr.vmem [resolvable:$true] %s215_s28 }
  0x36   : > { %s1424_s6 = scalar_lea.sflag [#allocation3], %s203_s29  ;;  %s1151_s12 = scalar_lea.hbm %s1414_s22, 256 }
  0x37   : > { %p1152_p0 = scmp.ne.s32.totalorder %s1414_s22, %s1151_s12  ;;  %p1153_p3 = pneg %p1420_p13 }
  0x38   : > { %s1156_s7 = scalar_lea.hbm %s1536_s1, 512  ;;  %p1157_p9 = scmp.lt.u32.totalorder %s1414_s22, %s1536_s1 }
  0x39   : > { %p1154_p5 = pnand %p1153_p3, %p1152_p0  ;;  %p1158_p1 = scmp.lt.u32.totalorder %s1156_s7, %s1151_s12 }
  0x3a   : > { %p1160_p4 = scmp.lt.u32.totalorder %s1151_s12, %s1414_s22 }
  0x3b   : > { %p1155_p7 = pneg %p1154_p5  ;;  %p1159_p2 = por %p1158_p1, %p1157_p9 }
  0x3d   : > { %p1161_p6 = por %p1160_p4, %p1159_p2 }
  0x3f   : > { %p1162_p8 = pnand %p1161_p6, %p1155_p7 }
  0x41   : > { %1165 = shalt.err (!%p1162_p8)
}
  0x42   : > { %s1166_s29 = scalar_lea.vmem %s1416_s28, 256  ;;  %s1272_s9 = smov [#allocation2]  }
  0x43   : > { %p1167_p12 = scmp.ne.s32.totalorder %s1416_s28, %s1166_s29  ;;  %s1171_s11 = sshll.u32 %s1272_s9, 4  ;;  %s1172_s11 = int_to_ptr.vmem [resolvable:$false] %s1171_s11 }
  0x44   : > { %s1173_s13 = scalar_lea.vmem %s1172_s11, 512  ;;  %p1174_p5 = scmp.lt.s32.totalorder %s1416_s28, %s1172_s11 }
  0x45   : > { %p1169_p11 = pnand %p1167_p12, %p1153_p3  ;;  %p1175_p9 = scmp.lt.s32.totalorder %s1173_s13, %s1166_s29 }
  0x47   : > { %p1170_p0 = pneg %p1169_p11  ;;  %p1176_p1 = por %p1175_p9, %p1174_p5 }
  0x49   : > { %p1177_p2 = pnand %p1176_p1, %p1170_p0 }
  0x4b   : > { %1180 = shalt.err (!%p1177_p2)
}
  0x4c   : > { %1061 = dma.hbm_to_vmem [thread:$0]  (!%p1420_p13), %s1414_s22, 256, %s1416_s28, %s1424_s6, %s1270_s14, %s1270_s14, %s1271_s21  }
  0x4d   : > { %p1554_p3 = scmp.ne.s32.totalorder %s1548_s27, 0 }
  0x4e   : > { %s1458_s12 = sand.u32 (!%p1554_p3), 1, %s1251_s16   ;;  %p1555_p7 = scmp.ne.s32.totalorder (!%p1554_p3), %s1546_s25, 0 }
  0x4f   : > { %227 = sbr.rel (%p1554_p3) target bundleno = 355 (0x163), region = 36  ;;  %s935_s7 = sshll.u32 (!%p1554_p3), %s1458_s12, 4 }
  0x50   : > { %s230_s24 = scalar_lea.sflag (!%p1554_p3), [#allocation3], %s1458_s12  ;;  %s233_s29 = scalar_lea.vmem (!%p1554_p3), [#allocation2], %s935_s7 }
  0x56   : > { %1234 = dma.done.wait (%p1555_p7), %s230_s24, 256  }
  0x57   : > { %1236 = vsyncadd (%p1555_p7), %s230_s24, 4294967040  ;;  %p1556_p4 = scmp.ne.s32.totalorder %s1544_s23, 0 }
  0x59   : > { %1238 = dma.done.wait (%p1556_p4), [#allocation6], 256  }
  0x5a   : > { %1240 = vsyncadd (%p1556_p4), [#allocation6], 4294967040  ;;  %v1273_v0 = vmov 0   ;;  %vm292_vm0 = vcmask 130048   ;;  %v278_v1 = vld [vmem:[%s233_s29] sm:$0xff]  ;;  %v279_v2 = vld [vmem:[%s233_s29 + $0x8] sm:$0xff] }
  0x5b   : > { %1122 = vset.pattern.permute.xlu0 %v1273_v0  ;;  %v276_v3 = vld [vmem:[#allocation5] sm:$0xff]  ;;  %v300_v4 = vand.u32 4294901760, %v278_v1  ;;  %v303_v5 = vand.u32 4294901760, %v279_v2  ;;  %v277_v6 = vld [vmem:[#allocation5 + $0x8] sm:$0xff]  ;;  %p269_p13 = scmp.lt.s32.totalorder %s1259_s18, 1  ;;  %s937_s28 = sshll.u32 %s1458_s12, 3 }
  0x5c   : > { %v294_v7 = vsel %vm292_vm0, %v276_v3, 0  ;;  %v280_v8 = vld [vmem:[%s1538_s3] sm:$0xff]  ;;  %v297_v9 = vsel %vm292_vm0, %v277_v6, 0  ;;  %v281_v16 = vld [vmem:[%s1538_s3 + $0x8] sm:$0xff]  ;;  %s940_s11 = sshll.u32 %s1259_s18, 7  ;;  %s268_s13 = scalar_lea.vmem [#allocation7], %s937_s28 }
  0x5d   : > { %v366_v10 = vand.u32 4294901760, %v294_v7  ;;  %284 = vperm.xlu0 %1122, %v280_v8   ;;  %v1010_v11 = vpack.c.bf16 %v303_v5, %v300_v4  ;;  %v376_v12 = vand.u32 4294901760, %v297_v9  ;;  %v388_v13 = vsub.f32 %v278_v1, %v300_v4  ;;  %s270_s21 = scalar_select %p269_p13, %s1259_s18, 1 }
  0x5e   : > { %v395_v14 = vsub.f32 %v279_v2, %v303_v5  ;;  %s820_s7 = sshll.u32 %s268_s13, 4  ;;  %s1486_s27 = scalar_lea.hbm %s1539_s4, %s940_s11  ;;  %s1488_s7 = int_to_ptr.vmem [resolvable:$true] %s820_s7 }
  0x5f   : > { %v367_v15 = vsub.f32 %v294_v7, %v366_v10  ;;  %1023 = vmatprep.subr.bf16.mxu0 %v1010_v11  ;;  %1011 = vmatprep.subr.bf16.mxu1 %v1010_v11  ;;  %v377_v17 = vsub.f32 %v297_v9, %v376_v12  ;;  %v389_v18 = vand.u32 4294901760, %v388_v13  ;;  %s938_s22 = sshll.u32 %s270_s21, 3  ;;  %s806_s14 = scalar_lea.sflag [#allocation4], %s1458_s12 }
  0x60   : > { %v396_v19 = vand.u32 4294901760, %v395_v14  ;;  %1025 = vmatpush3.bf16.msra.mxu0 %v1010_v11  ;;  %1013 = vmatpush3.bf16.msra.mxu1 %v1010_v11  ;;  %v1018_v32 = vpack.c.bf16 %v395_v14, %v388_v13  ;;  %s275_s9 = scalar_lea.vmem %s1535_s0, %s938_s22  ;;  %s1181_s23 = scalar_lea.vmem %s1488_s7, 128 }
  0x61   : > { %v368_v20 = vand.u32 4294901760, %v367_v15  ;;  %v378_v21 = vand.u32 4294901760, %v377_v17  ;;  %v390_v22 = vsub.f32 %v388_v13, %v389_v18  ;;  %289 = vperm.xlu0 %1122, %v281_v16   ;;  %v801_v42 = vld [vmem:[%s275_s9] sm:$0xff]  ;;  %p1182_p6 = scmp.ne.s32.totalorder %s1488_s7, %s1181_s23  ;;  %s1274_s18 = smov [#allocation7]  }
  0x62   : > { %v397_v23 = vsub.f32 %v395_v14, %v396_v19  ;;  %v1026_v24 = vpack.c.bf16 %v396_v19, %v389_v18  ;;  %s1185_s25 = sshll.u32 %s1274_s18, 4  ;;  %s1186_s25 = int_to_ptr.vmem [resolvable:$false] %s1185_s25 }
  0x63   : > { %993 = vmatprep.mubr.f32.mxu0 %v368_v20  ;;  %v369_v25 = vsub.f32 %v367_v15, %v368_v20  ;;  %v379_v26 = vsub.f32 %v377_v17, %v378_v21  ;;  %v391_v27 = vand.u32 4294901760, %v390_v22  ;;  %p1183_p8 = pnand %p1182_p6, %p1399_p10  ;;  %s1187_s21 = scalar_lea.vmem %s1186_s25, 256 }
  0x64   : > { %994 = vmatmul.mubr.f32.vlgmr.msra.gmra.mrb[0].mxu0 %v378_v21  ;;  %v398_v28 = vand.u32 4294901760, %v397_v23  ;;  %1027 = vmatprep.subr.bf16.mxu0 %v1026_v24  ;;  %p1188_p11 = scmp.lt.s32.totalorder %s1488_s7, %s1186_s25  ;;  %p1189_p0 = scmp.lt.s32.totalorder %s1187_s21, %s1181_s23 }
  0x65   : > { %v370_v29 = vand.u32 4294901760, %v369_v25  ;;  %1029 = vmatpush3.bf16.msra.mxu0 %v1026_v24  ;;  %1000 = vmatprep.mubr.f32.mxu0 %v366_v10  ;;  %v380_v30 = vand.u32 4294901760, %v379_v26  ;;  %p1184_p12 = pneg %p1183_p8 }
  0x66   : > { %v1014_v31 = vpack.c.bf16 %v398_v28, %v391_v27  ;;  %1031 = vmatprep.subr.bf16.mxu0 %v1010_v11  ;;  %p1190_p5 = por %p1189_p0, %p1188_p11 }
  0x67   : > { %972 = vmatprep.mubr.f32.mxu1 %v370_v29 }
  0x68   : > { %973 = vmatmul.mubr.f32.vlgmr.msra.gmra.mrb[0].mxu1 %v380_v30  ;;  %1015 = vmatprep.subr.bf16.mxu1 %v1014_v31  ;;  %p1191_p9 = pnand %p1190_p5, %p1184_p12 }
  0x69   : > { %1017 = vmatpush3.bf16.msra.mxu1 %v1014_v31  ;;  %979 = vmatprep.mubr.f32.mxu1 %v366_v10 }
  0x6a   : > { %1019 = vmatprep.subr.bf16.mxu1 %v1018_v32 }
  0x6c   : > { %1001 = vmatmul.mubr.f32.vlgmr.msra.gmra.mrb[0].mxu0 %v376_v12 }
  0x6d   : > { %1033 = vmatpush3.bf16.msra.mxu0 %v1010_v11  ;;  %1007 = vmatprep.mubr.f32.mxu0 %v366_v10 }
  0x70   : > { %980 = vmatmul.mubr.f32.vlgmr.msra.gmra.mrb[0].mxu1 %v376_v12 }
  0x71   : > { %1021 = vmatpush3.bf16.msra.mxu1 %v1018_v32  ;;  %986 = vmatprep.mubr.f32.mxu1 %v367_v15 }
  0x74   : > { %1008 = vmatmul.mubr.f32.vlgmr.msra.gmra.mrb[0].mxu0 %v376_v12 }
  0x78   : > { %987 = vmatmul.mubr.f32.vlgmr.msra.gmra.mrb[0].mxu1 %v377_v17 }
  0xdc   : > { %v285_v33 = vpop.permute.xlu0 %284 }
  0xe0   : > { %v290_v36 = vpop.permute.xlu0 %289 }
 0x147   : > { %v1009_v34 = vpop.f32.mrb[0].mxu0 }
 0x148   : > { %v791_v35 = vpop.f32.mrb[1].mxu0 }
 0x14b   : > { %v988_v37 = vpop.f32.mrb[0].mxu1 }
 0x14c   : > { %v1034_v38 = vadd.f32 %v988_v37, %v290_v36  ;;  %v545_v39 = vpop.f32.mrb[1].mxu1 }
 0x14d   : > { %v1036_v40 = vadd.f32 %v545_v39, %v285_v33 }
 0x14e   : > { %v1035_v41 = vadd.f32 %v1034_v38, %v1009_v34 }
 0x14f   : > { %v1037_v43 = vadd.f32 %v1036_v40, %v791_v35 }
 0x151   : > { %v802_v44 = vmul.f32 %v1037_v43, %v801_v42 }
 0x153   : > { %v803_v45 = vadd.f32 %v1035_v41, %v802_v44 }
 0x155   : > { %804 = vst [vmem:[%s268_s13] sm:$0xff] %v803_v45 }
 0x156   : > { %1194 = shalt.err (!%p1191_p9)
}
 0x157   : > { %s1195_s12 = scalar_lea.hbm %s1486_s27, 128  ;;  %s1199_s8 = scalar_lea.hbm %s1539_s4, 256 }
 0x158   : > { %p1196_p1 = scmp.ne.s32.totalorder %s1486_s27, %s1195_s12  ;;  %p1200_p7 = scmp.lt.u32.totalorder %s1486_s27, %s1539_s4 }
 0x159   : > { %p1201_p4 = scmp.lt.u32.totalorder %s1199_s8, %s1195_s12  ;;  %p1203_p6 = scmp.lt.u32.totalorder %s1195_s12, %s1486_s27 }
 0x15a   : > { %p1197_p2 = pnand %p1196_p1, %p1399_p10 }
 0x15b   : > { %p1202_p13 = por %p1201_p4, %p1200_p7 }
 0x15c   : > { %p1198_p3 = pneg %p1197_p2 }
 0x15d   : > { %p1204_p8 = por %p1203_p6, %p1202_p13 }
 0x15f   : > { %p1205_p12 = pnand %p1204_p8, %p1198_p3 }
 0x161   : > { %1208 = shalt.err (!%p1205_p12)
}
 0x162   : > { %1052 = dma.vmem_to_hbm [thread:$0]  (%p1399_p10), %s1488_s7, 128, %s1486_s27, %s806_s14  }
 0x163 PF: > { %s832_s11 = sand.u32 1, %s1247_s15   ;;  %p1557_p11 = scmp.ne.s32.totalorder %s1547_s26, 0 }
 0x164   : > { %p1558_p0 = scmp.ge.s32.totalorder %s1267_s20, 2  ;;  %s833_s13 = scalar_lea.sflag [#allocation4], %s832_s11 }
 0x166   : > { %p1063_p5 = pnand %p1558_p0, %p1557_p11 }
 0x168   : > { %1242 = dma.done.wait (!%p1063_p5), %s833_s13, 128  }
 0x169   : > { %1244 = vsyncadd (!%p1063_p5), %s833_s13, 4294967168  ;;  %s21_s20 = sadd.s32 1, %s1267_s20   ;;  %s1559_s15 = smov %s1251_s16 }
 0x16a   : > { %p18_p9 = scmp.ge.s32.totalorder %s21_s20, 4   ;;  %s1560_s16 = smov %s1255_s17 }
 0x16b   : > { %s1561_s17 = smov %s1408_s10  ;;  %s1562_s18 = smov %s1263_s19 }
 0x16c   : > { %s1563_s19 = smov %s1565_s5  ;;  %20 = sbr.rel (!%p18_p9) target bundleno = 7 (0x7), region = 88 }
 0x173   :  { %838 = vsyncpa [#allocation3], 1 }
 0x174   :  { %840 = vsyncpa [#allocation3 + $0x1], 1 }
 0x175   :  { %841 = vsyncpa [#allocation6], 1 }
 0x176   :  { %842 = vsyncpa [#allocation4], 1 }
 0x177   :  { %844 = vsyncpa [#allocation4 + $0x1], 1 }

// kernel: tpu_custom_call.1
= control target key start
LH: loop header
LB: loop body
LE: loop exit
PB: predicated region body
PF: predicated region fallthrough
CT: control target
= control target key end

     0   :  { %9 = vsyncpa [#allocation3], 0  ;;  %s1535_s0 = inlined_call_operand.vmem [shape: f32[2,8,128], index: 0, kind: input, shape index: {}]   ;;  %s1536_s1 = inlined_call_operand.hbm [shape: f32[2,16,128], index: 1, kind: input, shape index: {}]   ;;  %s1537_s2 = inlined_call_operand.hbm [shape: f32[16,16], index: 2, kind: input, shape index: {}]   ;;  %s1538_s3 = inlined_call_operand.vmem [shape: f32[16,1], index: 3, kind: input, shape index: {}]   ;;  %s1539_s4 = inlined_call_operand.hbm [shape: f32[2,8,128], index: 4, kind: output, shape index: {}]  }
   0x1   :  { %11 = vsyncpa [#allocation3 + $0x1], 0 }
   0x2   :  { %12 = vsyncpa [#allocation6], 0 }
   0x3   :  { %13 = vsyncpa [#allocation4], 0 }
   0x4   :  { %15 = vsyncpa [#allocation4 + $0x1], 0  ;;  %s1300_s15 = smov 0   ;;  %s1302_s16 = smov 0  }
   0x5   :  { %s1304_s17 = smov 0   ;;  %s1306_s18 = smov 0  }
   0x6   :  { %s1308_s19 = smov 0   ;;  %s1310_s20 = smov 0  }
   0x7 LB: > { %s926_s21 = sadd.s32 4294967295, %s1267_s20   ;;  %s927_s22 = sadd.s32 4294967294, %s1267_s20   ;;  %s1267_s20 = sphi %s1310_s20, %s21_s20   ;;  %s1263_s19 = sphi %s1308_s19, %s1563_s19   ;;  %s1259_s18 = sphi %s1306_s18, %s1562_s18   ;;  %s1255_s17 = sphi %s1304_s17, %s1561_s17   ;;  %s1251_s16 = sphi %s1302_s16, %s1560_s16   ;;  %s1247_s15 = sphi %s1300_s15, %s1559_s15  }
   0x8   : > { %p83_p0 = scmp.ne.s32.totalorder %s1251_s16, %s1247_s15  ;;  %p1334_p1 = scmp.eq.s32.totalorder %s926_s21, 0 }
   0x9   : > { %p1338_p2 = scmp.eq.s32.totalorder %s926_s21, 1  ;;  %p157_p3 = scmp.eq.s32.totalorder %s927_s22, 1 }
   0xa   : > { %s1544_s23 = scalar_select %p1334_p1, 1, 0 }
   0xb   : > { %s1545_s24 = scalar_select %p1338_p2, 1, 0 }
   0xc   : > { %p1344_p4 = por %p1334_p1, %p83_p0  ;;  %p928_p5 = scmp.ge.s32.totalorder %s1267_s20, 1 }
   0xd   : > { %p1349_p6 = por %p157_p3, %p83_p0  ;;  %p164_p7 = scmp.lt.s32.totalorder %s1267_s20, 3 }
   0xe   : > { %s1546_s25 = scalar_select %p1344_p4, 1, 0 }
   0xf   : > { %s1547_s26 = scalar_select %p1349_p6, 1, 0 }
  0x10   : > { %p1354_p8 = pnand %p928_p5, %p164_p7  ;;  %s1269_s28 = smov [#allocation5]  }
  0x11   : > { %s176_s29 = sshll.u32 %s1269_s28, 4  ;;  %s33_s5 = sadd.s32 1, %s1263_s19  ;;  %s177_s29 = int_to_ptr.vmem [resolvable:$true] %s176_s29 }
  0x12   : > { %s1548_s27 = scalar_select %p1354_p8, 1, 0 }
  0x13   : > { %p1054_p9 = pneg %p1354_p8  ;;  %s1123_s8 = scalar_lea.hbm %s1537_s2, 256 }
  0x14   : > { %p1124_p12 = scmp.ne.s32.totalorder %s1537_s2, %s1123_s8  ;;  %p1130_p5 = scmp.lt.u32.totalorder %s1123_s8, %s1537_s2 }
  0x15   : > { %p1363_p11 = pnand %p1054_p9, %p1334_p1 }
  0x17   : > { %p1125_p13 = pneg %p1363_p11 }
  0x19   : > { %p1126_p0 = pnand %p1125_p13, %p1124_p12 }
  0x1b   : > { %p1127_p3 = pneg %p1126_p0 }
  0x1d   : > { %p1132_p7 = pnand %p1130_p5, %p1127_p3 }
  0x1f   : > { %1135 = shalt.err (!%p1132_p7)
}
  0x20   : > { %s1136_s13 = scalar_lea.vmem %s177_s29, 256  ;;  %p1144_p1 = scmp.lt.s32.totalorder %s177_s29, %s177_s29 }
  0x21   : > { %p1137_p9 = scmp.ne.s32.totalorder %s177_s29, %s1136_s13  ;;  %p1145_p4 = scmp.lt.s32.totalorder %s1136_s13, %s1136_s13 }
  0x23   : > { %p1139_p10 = pnand %p1137_p9, %p1125_p13  ;;  %p1146_p8 = por %p1145_p4, %p1144_p1 }
  0x25   : > { %p1140_p6 = pneg %p1139_p10 }
  0x27   : > { %p1147_p2 = pnand %p1146_p8, %p1140_p6 }
  0x29   : > { %1150 = shalt.err (!%p1147_p2)
}
  0x2a   : > { %s1270_s14 = smov 128   ;;  %s1271_s21 = smov 8  }
  0x2b   : > { %1057 = dma.hbm_to_vmem [thread:$0]  (!%p1363_p11), %s1537_s2, 256, %s177_s29, [#allocation6], %s1270_s14, %s1270_s14, %s1271_s21  }
  0x2c   : > { %p35_p1 = scmp.ge.s32.totalorder %s33_s5, 2  ;;  %s70_s6 = sadd.s32 1, %s1255_s17 }
  0x2d   : > { %p77_p2 = scmp.ne.s32.totalorder %s1255_s17, %s1251_s16  ;;  %p78_p4 = scmp.eq.s32.totalorder %s1267_s20, 0 }
  0x2e   : > { %s1565_s5 = smov (%p35_p1, %s33_s5), 0  ;;  %p1551_p8 = scmp.ne.s32.totalorder %s1545_s24, 0 }
  0x2f   : > { %p1393_p6 = por %p78_p4, %p77_p2  ;;  %s65_s8 = ssub.s32 %s1263_s19, %s1565_s5 }
  0x30   : > { %p1399_p10 = por %p1551_p8, %p77_p2  ;;  %p1067_p12 = scmp.lt.s32.totalorder %s1267_s20, 2 }
  0x31   : > { %p68_p11 = scmp.eq.s32.totalorder %s65_s8, 0  ;;  %s203_s29 = sand.u32 1, %s1255_s17  }
  0x32   : > { %s931_s9 = sshll.u32 %s203_s29, 4  ;;  %s943_s11 = sshll.u32 %s1263_s19, 8 }
  0x33   : > { %s1408_s10 = scalar_select %p68_p11, %s1255_s17, %s70_s6  }
  0x34   : > { %s1414_s22 = scalar_lea.hbm %s1536_s1, %s943_s11  ;;  %s207_s24 = scalar_lea.vmem [#allocation2], %s931_s9 }
  0x35   : > { %s215_s28 = sshll.u32 %s207_s24, 4  ;;  %p1420_p13 = pnand %p1067_p12, %p1393_p6  ;;  %s1416_s28 = int_to_ptr.vmem [resolvable:$true] %s215_s28 }
  0x36   : > { %s1424_s6 = scalar_lea.sflag [#allocation3], %s203_s29  ;;  %s1151_s12 = scalar_lea.hbm %s1414_s22, 256 }
  0x37   : > { %p1152_p0 = scmp.ne.s32.totalorder %s1414_s22, %s1151_s12  ;;  %p1153_p3 = pneg %p1420_p13 }
  0x38   : > { %s1156_s7 = scalar_lea.hbm %s1536_s1, 512  ;;  %p1157_p9 = scmp.lt.u32.totalorder %s1414_s22, %s1536_s1 }
  0x39   : > { %p1154_p5 = pnand %p1153_p3, %p1152_p0  ;;  %p1158_p1 = scmp.lt.u32.totalorder %s1156_s7, %s1151_s12 }
  0x3a   : > { %p1160_p4 = scmp.lt.u32.totalorder %s1151_s12, %s1414_s22 }
  0x3b   : > { %p1155_p7 = pneg %p1154_p5  ;;  %p1159_p2 = por %p1158_p1, %p1157_p9 }
  0x3d   : > { %p1161_p6 = por %p1160_p4, %p1159_p2 }
  0x3f   : > { %p1162_p8 = pnand %p1161_p6, %p1155_p7 }
  0x41   : > { %1165 = shalt.err (!%p1162_p8)
}
  0x42   : > { %s1166_s29 = scalar_lea.vmem %s1416_s28, 256  ;;  %s1272_s9 = smov [#allocation2]  }
  0x43   : > { %p1167_p12 = scmp.ne.s32.totalorder %s1416_s28, %s1166_s29  ;;  %s1171_s11 = sshll.u32 %s1272_s9, 4  ;;  %s1172_s11 = int_to_ptr.vmem [resolvable:$false] %s1171_s11 }
  0x44   : > { %s1173_s13 = scalar_lea.vmem %s1172_s11, 512  ;;  %p1174_p5 = scmp.lt.s32.totalorder %s1416_s28, %s1172_s11 }
  0x45   : > { %p1169_p11 = pnand %p1167_p12, %p1153_p3  ;;  %p1175_p9 = scmp.lt.s32.totalorder %s1173_s13, %s1166_s29 }
  0x47   : > { %p1170_p0 = pneg %p1169_p11  ;;  %p1176_p1 = por %p1175_p9, %p1174_p5 }
  0x49   : > { %p1177_p2 = pnand %p1176_p1, %p1170_p0 }
  0x4b   : > { %1180 = shalt.err (!%p1177_p2)
}
  0x4c   : > { %1061 = dma.hbm_to_vmem [thread:$0]  (!%p1420_p13), %s1414_s22, 256, %s1416_s28, %s1424_s6, %s1270_s14, %s1270_s14, %s1271_s21  }
  0x4d   : > { %p1554_p3 = scmp.ne.s32.totalorder %s1548_s27, 0 }
  0x4e   : > { %s1458_s12 = sand.u32 (!%p1554_p3), 1, %s1251_s16   ;;  %p1555_p7 = scmp.ne.s32.totalorder (!%p1554_p3), %s1546_s25, 0 }
  0x4f   : > { %227 = sbr.rel (%p1554_p3) target bundleno = 355 (0x163), region = 36  ;;  %s935_s7 = sshll.u32 (!%p1554_p3), %s1458_s12, 4 }
  0x50   : > { %s230_s24 = scalar_lea.sflag (!%p1554_p3), [#allocation3], %s1458_s12  ;;  %s233_s29 = scalar_lea.vmem (!%p1554_p3), [#allocation2], %s935_s7 }
  0x56   : > { %1234 = dma.done.wait (%p1555_p7), %s230_s24, 256  }
  0x57   : > { %1236 = vsyncadd (%p1555_p7), %s230_s24, 4294967040  ;;  %p1556_p4 = scmp.ne.s32.totalorder %s1544_s23, 0 }
  0x59   : > { %1238 = dma.done.wait (%p1556_p4), [#allocation6], 256  }
  0x5a   : > { %1240 = vsyncadd (%p1556_p4), [#allocation6], 4294967040  ;;  %v1273_v0 = vmov 0   ;;  %vm292_vm0 = vcmask 130048   ;;  %v278_v1 = vld [vmem:[%s233_s29] sm:$0xff]  ;;  %v279_v2 = vld [vmem:[%s233_s29 + $0x8] sm:$0xff] }
  0x5b   : > { %1122 = vset.pattern.permute.xlu0 %v1273_v0  ;;  %v276_v3 = vld [vmem:[#allocation5] sm:$0xff]  ;;  %v300_v4 = vand.u32 4294901760, %v278_v1  ;;  %v303_v5 = vand.u32 4294901760, %v279_v2  ;;  %v277_v6 = vld [vmem:[#allocation5 + $0x8] sm:$0xff]  ;;  %p269_p13 = scmp.lt.s32.totalorder %s1259_s18, 1  ;;  %s937_s28 = sshll.u32 %s1458_s12, 3 }
  0x5c   : > { %v294_v7 = vsel %vm292_vm0, %v276_v3, 0  ;;  %v280_v8 = vld [vmem:[%s1538_s3] sm:$0xff]  ;;  %v297_v9 = vsel %vm292_vm0, %v277_v6, 0  ;;  %v281_v16 = vld [vmem:[%s1538_s3 + $0x8] sm:$0xff]  ;;  %s940_s11 = sshll.u32 %s1259_s18, 7  ;;  %s268_s13 = scalar_lea.vmem [#allocation7], %s937_s28 }
  0x5d   : > { %v366_v10 = vand.u32 4294901760, %v294_v7  ;;  %284 = vperm.xlu0 %1122, %v280_v8   ;;  %v1010_v11 = vpack.c.bf16 %v303_v5, %v300_v4  ;;  %v376_v12 = vand.u32 4294901760, %v297_v9  ;;  %v388_v13 = vsub.f32 %v278_v1, %v300_v4  ;;  %s270_s21 = scalar_select %p269_p13, %s1259_s18, 1 }
  0x5e   : > { %v395_v14 = vsub.f32 %v279_v2, %v303_v5  ;;  %s820_s7 = sshll.u32 %s268_s13, 4  ;;  %s1486_s27 = scalar_lea.hbm %s1539_s4, %s940_s11  ;;  %s1488_s7 = int_to_ptr.vmem [resolvable:$true] %s820_s7 }
  0x5f   : > { %v367_v15 = vsub.f32 %v294_v7, %v366_v10  ;;  %1023 = vmatprep.subr.bf16.mxu0 %v1010_v11  ;;  %1011 = vmatprep.subr.bf16.mxu1 %v1010_v11  ;;  %v377_v17 = vsub.f32 %v297_v9, %v376_v12  ;;  %v389_v18 = vand.u32 4294901760, %v388_v13  ;;  %s938_s22 = sshll.u32 %s270_s21, 3  ;;  %s806_s14 = scalar_lea.sflag [#allocation4], %s1458_s12 }
  0x60   : > { %v396_v19 = vand.u32 4294901760, %v395_v14  ;;  %1025 = vmatpush3.bf16.msra.mxu0 %v1010_v11  ;;  %1013 = vmatpush3.bf16.msra.mxu1 %v1010_v11  ;;  %v1018_v32 = vpack.c.bf16 %v395_v14, %v388_v13  ;;  %s275_s9 = scalar_lea.vmem %s1535_s0, %s938_s22  ;;  %s1181_s23 = scalar_lea.vmem %s1488_s7, 128 }
  0x61   : > { %v368_v20 = vand.u32 4294901760, %v367_v15  ;;  %v378_v21 = vand.u32 4294901760, %v377_v17  ;;  %v390_v22 = vsub.f32 %v388_v13, %v389_v18  ;;  %289 = vperm.xlu0 %1122, %v281_v16   ;;  %v801_v42 = vld [vmem:[%s275_s9] sm:$0xff]  ;;  %p1182_p6 = scmp.ne.s32.totalorder %s1488_s7, %s1181_s23  ;;  %s1274_s18 = smov [#allocation7]  }
  0x62   : > { %v397_v23 = vsub.f32 %v395_v14, %v396_v19  ;;  %v1026_v24 = vpack.c.bf16 %v396_v19, %v389_v18  ;;  %s1185_s25 = sshll.u32 %s1274_s18, 4  ;;  %s1186_s25 = int_to_ptr.vmem [resolvable:$false] %s1185_s25 }
  0x63   : > { %993 = vmatprep.mubr.f32.mxu0 %v368_v20  ;;  %v369_v25 = vsub.f32 %v367_v15, %v368_v20  ;;  %v379_v26 = vsub.f32 %v377_v17, %v378_v21  ;;  %v391_v27 = vand.u32 4294901760, %v390_v22  ;;  %p1183_p8 = pnand %p1182_p6, %p1399_p10  ;;  %s1187_s21 = scalar_lea.vmem %s1186_s25, 256 }
  0x64   : > { %994 = vmatmul.mubr.f32.vlgmr.msra.gmra.mrb[0].mxu0 %v378_v21  ;;  %v398_v28 = vand.u32 4294901760, %v397_v23  ;;  %1027 = vmatprep.subr.bf16.mxu0 %v1026_v24  ;;  %p1188_p11 = scmp.lt.s32.totalorder %s1488_s7, %s1186_s25  ;;  %p1189_p0 = scmp.lt.s32.totalorder %s1187_s21, %s1181_s23 }
  0x65   : > { %v370_v29 = vand.u32 4294901760, %v369_v25  ;;  %1029 = vmatpush3.bf16.msra.mxu0 %v1026_v24  ;;  %1000 = vmatprep.mubr.f32.mxu0 %v366_v10  ;;  %v380_v30 = vand.u32 4294901760, %v379_v26  ;;  %p1184_p12 = pneg %p1183_p8 }
  0x66   : > { %v1014_v31 = vpack.c.bf16 %v398_v28, %v391_v27  ;;  %1031 = vmatprep.subr.bf16.mxu0 %v1010_v11  ;;  %p1190_p5 = por %p1189_p0, %p1188_p11 }
  0x67   : > { %972 = vmatprep.mubr.f32.mxu1 %v370_v29 }
  0x68   : > { %973 = vmatmul.mubr.f32.vlgmr.msra.gmra.mrb[0].mxu1 %v380_v30  ;;  %1015 = vmatprep.subr.bf16.mxu1 %v1014_v31  ;;  %p1191_p9 = pnand %p1190_p5, %p1184_p12 }
  0x69   : > { %1017 = vmatpush3.bf16.msra.mxu1 %v1014_v31  ;;  %979 = vmatprep.mubr.f32.mxu1 %v366_v10 }
  0x6a   : > { %1019 = vmatprep.subr.bf16.mxu1 %v1018_v32 }
  0x6c   : > { %1001 = vmatmul.mubr.f32.vlgmr.msra.gmra.mrb[0].mxu0 %v376_v12 }
  0x6d   : > { %1033 = vmatpush3.bf16.msra.mxu0 %v1010_v11  ;;  %1007 = vmatprep.mubr.f32.mxu0 %v366_v10 }
  0x70   : > { %980 = vmatmul.mubr.f32.vlgmr.msra.gmra.mrb[0].mxu1 %v376_v12 }
  0x71   : > { %1021 = vmatpush3.bf16.msra.mxu1 %v1018_v32  ;;  %986 = vmatprep.mubr.f32.mxu1 %v367_v15 }
  0x74   : > { %1008 = vmatmul.mubr.f32.vlgmr.msra.gmra.mrb[0].mxu0 %v376_v12 }
  0x78   : > { %987 = vmatmul.mubr.f32.vlgmr.msra.gmra.mrb[0].mxu1 %v377_v17 }
  0xdc   : > { %v285_v33 = vpop.permute.xlu0 %284 }
  0xe0   : > { %v290_v36 = vpop.permute.xlu0 %289 }
 0x147   : > { %v1009_v34 = vpop.f32.mrb[0].mxu0 }
 0x148   : > { %v791_v35 = vpop.f32.mrb[1].mxu0 }
 0x14b   : > { %v988_v37 = vpop.f32.mrb[0].mxu1 }
 0x14c   : > { %v1034_v38 = vadd.f32 %v988_v37, %v290_v36  ;;  %v545_v39 = vpop.f32.mrb[1].mxu1 }
 0x14d   : > { %v1036_v40 = vadd.f32 %v545_v39, %v285_v33 }
 0x14e   : > { %v1035_v41 = vadd.f32 %v1034_v38, %v1009_v34 }
 0x14f   : > { %v1037_v43 = vadd.f32 %v1036_v40, %v791_v35 }
 0x151   : > { %v802_v44 = vmul.f32 %v1037_v43, %v801_v42 }
 0x153   : > { %v803_v45 = vadd.f32 %v1035_v41, %v802_v44 }
 0x155   : > { %804 = vst [vmem:[%s268_s13] sm:$0xff] %v803_v45 }
 0x156   : > { %1194 = shalt.err (!%p1191_p9)
}
 0x157   : > { %s1195_s12 = scalar_lea.hbm %s1486_s27, 128  ;;  %s1199_s8 = scalar_lea.hbm %s1539_s4, 256 }
 0x158   : > { %p1196_p1 = scmp.ne.s32.totalorder %s1486_s27, %s1195_s12  ;;  %p1200_p7 = scmp.lt.u32.totalorder %s1486_s27, %s1539_s4 }
 0x159   : > { %p1201_p4 = scmp.lt.u32.totalorder %s1199_s8, %s1195_s12  ;;  %p1203_p6 = scmp.lt.u32.totalorder %s1195_s12, %s1486_s27 }
 0x15a   : > { %p1197_p2 = pnand %p1196_p1, %p1399_p10 }
 0x15b   : > { %p1202_p13 = por %p1201_p4, %p1200_p7 }
 0x15c   : > { %p1198_p3 = pneg %p1197_p2 }
 0x15d   : > { %p1204_p8 = por %p1203_p6, %p1202_p13 }
 0x15f   : > { %p1205_p12 = pnand %p1204_p8, %p1198_p3 }
 0x161   : > { %1208 = shalt.err (!%p1205_p12)
}
 0x162   : > { %1052 = dma.vmem_to_hbm [thread:$0]  (%p1399_p10), %s1488_s7, 128, %s1486_s27, %s806_s14  }
 0x163 PF: > { %s832_s11 = sand.u32 1, %s1247_s15   ;;  %p1557_p11 = scmp.ne.s32.totalorder %s1547_s26, 0 }
 0x164   : > { %p1558_p0 = scmp.ge.s32.totalorder %s1267_s20, 2  ;;  %s833_s13 = scalar_lea.sflag [#allocation4], %s832_s11 }
 0x166   : > { %p1063_p5 = pnand %p1558_p0, %p1557_p11 }
 0x168   : > { %1242 = dma.done.wait (!%p1063_p5), %s833_s13, 128  }
 0x169   : > { %1244 = vsyncadd (!%p1063_p5), %s833_s13, 4294967168  ;;  %s21_s20 = sadd.s32 1, %s1267_s20   ;;  %s1559_s15 = smov %s1251_s16 }
 0x16a   : > { %p18_p9 = scmp.ge.s32.totalorder %s21_s20, 4   ;;  %s1560_s16 = smov %s1255_s17 }
 0x16b   : > { %s1561_s17 = smov %s1408_s10  ;;  %s1562_s18 = smov %s1263_s19 }
 0x16c   : > { %s1563_s19 = smov %s1565_s5  ;;  %20 = sbr.rel (!%p18_p9) target bundleno = 7 (0x7), region = 88 }
 0x173   :  { %838 = vsyncpa [#allocation3], 1 }
 0x174   :  { %840 = vsyncpa [#allocation3 + $0x1], 1 }
 0x175   :  { %841 = vsyncpa [#allocation6], 1 }
 0x176   :  { %842 = vsyncpa [#allocation4], 1 }
 0x177   :  { %844 = vsyncpa [#allocation4 + $0x1], 1 }

</bundles_post_ra>
